<compile_context>
chip_gen: v7x
topology: tpu7x:2x2x1
jax: 0.10.0
libtpu: 0.0.40
codegen_flags: <defaults>
</compile_context>

<pallas_src>
import jax
import jax.numpy as jnp
import numpy as np
from jax.experimental import pallas as pl
from jax.experimental.pallas import tpu as pltpu

_LANES = 128      # lane-dense output slab width; lanes 0..2 carry (u, v, d)
_IDX_ROWS = 8     # index matrix padded to a full sublane tile (rows 0..3 used)
_MB = 1024 * 1024


def _integral_kernel(hm_ref, idx_ref, out_ref):
    """Softmax over the flattened voxel axis + per-axis soft-argmax for a block of rows.

    hm_ref : (R, DHW)  heatmap logits (any float dtype; upcast to f32 per tile)
    idx_ref: (8, DHW)  rows 0..2 = (i%W)/W, ((i//W)%H)/H, (i//(H*W))/D; row 3 = ones
    out_ref: (R, 128)  lane-dense output slab; lanes 0..2 = (u, v, d), rest zero
    """
    hm = hm_ref[...].astype(jnp.float32)                  # (R, DHW)
    m = jnp.max(hm, axis=-1, keepdims=True)               # (R, 1)
    e = jnp.exp(hm - m)                                    # (R, DHW) unnormalized softmax

    # One MXU matmul fuses all four reductions: contract the lane dim of e with the
    # lane dim of the lane-dense (8, DHW) index table (no transpose of idx needed).
    # Columns: 0 -> sum(e*x/W), 1 -> sum(e*y/H), 2 -> sum(e*z/D), 3 -> sum(e), 4..7 -> 0.
    sums = jax.lax.dot_general(
        e, idx_ref[...],
        dimension_numbers=(((1,), (1,)), ((), ())),
        preferred_element_type=jnp.float32,
        precision=jax.lax.Precision.HIGHEST,
    )                                                      # (R, 8)

    # Softmax normalization (and the reference's redundant second renorm, a mathematical
    # no-op) folded into one tiny (R, 1) reciprocal applied to the results.
    inv_s = 1.0 / sums[:, 3:4]
    cx = sums[:, 0:1] * inv_s - 0.5
    cy = sums[:, 1:2] * inv_s - 0.5
    cz = sums[:, 2:3] * inv_s - 0.5

    rows, lanes = out_ref.shape
    lane = jax.lax.broadcasted_iota(jnp.int32, (rows, lanes), 1)
    out_ref[...] = jnp.where(lane == 0, cx,
                     jnp.where(lane == 1, cy,
                       jnp.where(lane == 2, cz, 0.0)))


def _round_up(x, m):
    return ((x + m - 1) // m) * m


def _tpu_topology():
    """(vmem_capacity_bytes, tensorcores_per_chip), with conservative fallbacks."""
    vmem_cap = 128 * _MB
    num_cores = 0
    try:
        info = pltpu.get_tpu_info()
        vmem_cap = int(getattr(info, "vmem_capacity_bytes", vmem_cap) or vmem_cap)
        for name in ("num_cores", "num_tensorcores", "tensorcores_per_chip", "cores_per_chip"):
            val = getattr(info, name, None)
            if val:
                num_cores = int(val)
                break
    except Exception:
        pass
    if num_cores <= 0:
        # Heuristic: 64 MiB-per-TC parts (v7x) have 2 TensorCores per chip.
        num_cores = 2 if vmem_cap <= 64 * _MB else 1
    return vmem_cap, num_cores


def _choose_block_rows(rows, dhw, in_itemsize, vmem_cap, num_cores):
    """Rows per grid step: sublane aligned (16 for packed dtypes), sized from a
    generation-aware VMEM budget, split only on multi-TC parts (>=2 steps/core)."""
    align = 16 if in_itemsize < 4 else 8
    # Per-row VMEM footprint: double-buffered input block + one f32 exp() temp.
    bytes_per_row = dhw * (2 * in_itemsize + 4)
    # Per-buffer budget: generous on 128 MiB parts (v5e/v6e), tight on 64 MiB v7x.
    budget = 24 * _MB if vmem_cap >= 96 * _MB else 6 * _MB
    max_rows = max(align, min(1024, (budget // bytes_per_row) // align * align))

    br = min(_round_up(rows, align), max_rows)

    # Multi-core parts: want >= 2 grid steps per core so each core's pipeline can overlap
    # the next block's DMA with compute. Single-core parts keep the largest block.
    if num_cores > 1:
        target_steps = 2 * num_cores
        while br > 16 and pl.cdiv(rows, br) < target_steps:
            new_br = max(16, _round_up(br // 2, 16))
            if new_br >= br:
                break
            br = new_br
    return br


def heatmap_integral_uvd(out_nchw, num_joints, depth_dim, height_dim, width_dim):
    """out_nchw: (B, J*D, H, W) float heatmap logits. Returns pred_uvd_jts (B, J, 3)."""
    B = out_nchw.shape[0]
    J, D, H, W = num_joints, depth_dim, height_dim, width_dim
    DHW = D * H * W
    rows = B * J

    # Collapse batch and joints into one sublane-dense row axis: (B*J, DHW), matching
    # out.reshape((B, J, -1)) memory order. No pad, no astype (metadata-only reshape).
    hm = out_nchw.reshape(rows, DHW)

    vmem_cap, num_cores = _tpu_topology()
    block_rows = _choose_block_rows(rows, DHW, hm.dtype.itemsize, vmem_cap, num_cores)
    grid = (pl.cdiv(rows, block_rows),)
    vmem_limit = min(vmem_cap * 3 // 4, 100 * _MB)

    # Lane-dense (8, DHW) index table: rows 0..2 pre-scaled by 1/W, 1/H, 1/D (exact in f32
    # while DHW < 2**24), row 3 = ones (softmax denominator), rows 4..7 zero padding.
    i = np.arange(DHW, dtype=np.float64)
    idx_np = np.zeros((_IDX_ROWS, DHW), dtype=np.float32)
    idx_np[0] = (i % W) / float(W)
    idx_np[1] = ((i // W) % H) / float(H)
    idx_np[2] = (i // (H * W)) / float(D)
    idx_np[3] = 1.0
    idx = jnp.asarray(idx_np)

    def build(single_buffer_idx):
        idx_kwargs = {}
        if single_buffer_idx and hasattr(pl, "Buffered"):
            # Invariant table (index_map always (0,0)): a single buffer returns its
            # double-buffer copy's VMEM to the heatmap blocks (matters at DHW ~ 64^3 on v7x).
            idx_kwargs["pipeline_mode"] = pl.Buffered(1)
        try:
            idx_spec = pl.BlockSpec((_IDX_ROWS, DHW), lambda r: (0, 0), **idx_kwargs)
        except TypeError:
            idx_spec = pl.BlockSpec((_IDX_ROWS, DHW), lambda r: (0, 0))
        return pl.pallas_call(
            _integral_kernel,
            out_shape=jax.ShapeDtypeStruct((rows, _LANES), jnp.float32),
            grid_spec=pltpu.PrefetchScalarGridSpec(
                num_scalar_prefetch=0,
                grid=grid,
                in_specs=[
                    pl.BlockSpec((block_rows, DHW), lambda r: (r, 0)),
                    idx_spec,
                ],
                out_specs=pl.BlockSpec((block_rows, _LANES), lambda r: (r, 0)),
            ),
            compiler_params=pltpu.CompilerParams(
                dimension_semantics=("parallel",),
                vmem_limit_bytes=int(vmem_limit),
            ),
        )

    try:
        out = build(True)(hm, idx)
    except Exception:
        # Fallback if this jax build rejects pipeline_mode on a TPU BlockSpec.
        out = build(False)(hm, idx)

    # Slice the lane-dense slab back to (B, J, 3).
    return out[:rows, :3].reshape(B, J, 3)


def get_intrinsic_matrix_batch_inv(f, c, bsz):
    """Plain-JAX glue equivalent of get_intrinsic_matrix_batch(..., inv=True)."""
    fx, fy = f
    cx, cy = c
    zeros = jnp.zeros((bsz,), jnp.float32)
    ones = jnp.ones((bsz,), jnp.float32)
    row0 = jnp.stack([1.0 / fx, zeros, -cx / fx], axis=-1)
    row1 = jnp.stack([zeros, 1.0 / fy, -cy / fy], axis=-1)
    row2 = jnp.stack([zeros, zeros, ones], axis=-1)
    return jnp.stack([row0, row1, row2], axis=1)  # (B, 3, 3)


def reference_uvd(out_nchw, J, D, H, W):
    """Pure-JAX reference matching the PyTorch resnet/softmax branch exactly."""
    B = out_nchw.shape[0]
    hm = out_nchw.reshape(B, J, -1).astype(jnp.float32)
    p = jax.nn.softmax(hm, axis=2)
    p = p / jnp.sum(p, axis=2, keepdims=True)
    p = p.reshape(B, J, D, H, W)
    hm_x = p.sum(axis=(2, 3))  # (B, J, W)
    hm_y = p.sum(axis=(2, 4))  # (B, J, H)
    hm_z = p.sum(axis=(3, 4))  # (B, J, D)
    cx = jnp.sum(hm_x * jnp.arange(W, dtype=jnp.float32), axis=2, keepdims=True) / W - 0.5
    cy = jnp.sum(hm_y * jnp.arange(H, dtype=jnp.float32), axis=2, keepdims=True) / H - 0.5
    cz = jnp.sum(hm_z * jnp.arange(D, dtype=jnp.float32), axis=2, keepdims=True) / D - 0.5
    return jnp.concatenate([cx, cy, cz], axis=2)


if __name__ == "__main__":
    B, J, D, H, W = 2, 4, 8, 8, 8

    key = jax.random.PRNGKey(0)
    k_hm, _ = jax.random.split(key)
    # Heatmap logits in NCHW, as a conv head would produce: (B, J*D, H, W).
    out_nchw = jax.random.normal(k_hm, (B, J * D, H, W), dtype=jnp.float32)

    # Deterministic synthetic camera intrinsics (glue only; used by uvd_to_xyz, whose
    # definition is not available -> see TODO at top).
    fx = jnp.full((B,), 1000.0, jnp.float32)
    fy = jnp.full((B,), 1000.0, jnp.float32)
    cx = jnp.full((B,), 128.0, jnp.float32)
    cy = jnp.full((B,), 128.0, jnp.float32)
    inv_k = get_intrinsic_matrix_batch_inv((fx, fy), (cx, cy), B)

    pred_uvd = jax.block_until_ready(heatmap_integral_uvd(out_nchw, J, D, H, W))
    ref = jax.block_until_ready(reference_uvd(out_nchw, J, D, H, W))
    np.testing.assert_allclose(np.asarray(pred_uvd), np.asarray(ref), atol=2e-5, rtol=1e-4)

    _ = jax.block_until_ready(inv_k)
    print("KERNEL_OK")
</pallas_src>

<mosaic_0001>
module attributes {stable_mosaic.version = 11 : i64} {
  func.func @_integral_kernel(%arg0: i32, %arg1: memref<8x512xf32, #tpu.memory_space<vmem>>, %arg2: memref<8x512xf32, #tpu.memory_space<vmem>>, %arg3: memref<8x128xf32, #tpu.memory_space<vmem>>) attributes {dimension_semantics = [#tpu.dimension_semantics<parallel>], iteration_bounds = array<i64: 1>, scalar_prefetch = 0 : i64, scratch_operands = 0 : i64, tpu.core_type = #tpu.core_type<tc>, window_params = [{transform_indices = @transform_0, window_bounds = array<i64: 8, 512>}, {pipeline_mode = #tpu.pipeline_mode<synchronous>, transform_indices = @transform_1, window_bounds = array<i64: 8, 512>}, {transform_indices = @transform_2, window_bounds = array<i64: 8, 128>}]} {
    %c0 = arith.constant 0 : index
    %c0_0 = arith.constant 0 : index
    %0 = vector.load %arg1[%c0, %c0_0] : memref<8x512xf32, #tpu.memory_space<vmem>>, vector<8x512xf32>
    %cst = arith.constant dense<0xFF800000> : vector<8xf32>
    %1 = vector.multi_reduction <maximumf>, %0, %cst [1] : vector<8x512xf32> to vector<8xf32>
    %2 = vector.shape_cast %1 : vector<8xf32> to vector<8x1xf32>
    %3 = vector.broadcast %2 : vector<8x1xf32> to vector<8x512xf32>
    %4 = arith.subf %0, %3 : vector<8x512xf32>
    %5 = math.exp %4 : vector<8x512xf32>
    %c0_1 = arith.constant 0 : index
    %c0_2 = arith.constant 0 : index
    %6 = vector.load %arg2[%c0_1, %c0_2] : memref<8x512xf32, #tpu.memory_space<vmem>>, vector<8x512xf32>
    %cst_3 = arith.constant dense<0.000000e+00> : vector<8x8xf32>
    %7 = tpu.matmul %5, %6, %cst_3 {dimension_numbers = #tpu.dot_dimension_numbers<[1], [1], [0], [0], [0, 0, 1, 0], [], []>, precision = #tpu.contract_precision<fp32>} : vector<8x512xf32>, vector<8x512xf32>, vector<8x8xf32> -> vector<8x8xf32>
    %8 = vector.extract_strided_slice %7 {offsets = [0, 3], sizes = [8, 1], strides = [1, 1]} : vector<8x8xf32> to vector<8x1xf32>
    %cst_4 = arith.constant 1.000000e+00 : f32
    %9 = vector.broadcast %cst_4 : f32 to vector<8x1xf32>
    %10 = arith.divf %9, %8 : vector<8x1xf32>
    %11 = vector.extract_strided_slice %7 {offsets = [0, 0], sizes = [8, 1], strides = [1, 1]} : vector<8x8xf32> to vector<8x1xf32>
    %12 = arith.mulf %11, %10 : vector<8x1xf32>
    %cst_5 = arith.constant 5.000000e-01 : f32
    %13 = vector.broadcast %cst_5 : f32 to vector<8x1xf32>
    %14 = arith.subf %12, %13 : vector<8x1xf32>
    %15 = vector.extract_strided_slice %7 {offsets = [0, 1], sizes = [8, 1], strides = [1, 1]} : vector<8x8xf32> to vector<8x1xf32>
    %16 = arith.mulf %15, %10 : vector<8x1xf32>
    %cst_6 = arith.constant 5.000000e-01 : f32
    %17 = vector.broadcast %cst_6 : f32 to vector<8x1xf32>
    %18 = arith.subf %16, %17 : vector<8x1xf32>
    %19 = vector.extract_strided_slice %7 {offsets = [0, 2], sizes = [8, 1], strides = [1, 1]} : vector<8x8xf32> to vector<8x1xf32>
    %20 = arith.mulf %19, %10 : vector<8x1xf32>
    %cst_7 = arith.constant 5.000000e-01 : f32
    %21 = vector.broadcast %cst_7 : f32 to vector<8x1xf32>
    %22 = arith.subf %20, %21 : vector<8x1xf32>
    %23 = tpu.iota {dimensions = array<i32: 1>} : vector<8x128xi32>
    %c0_i32 = arith.constant 0 : i32
    %24 = vector.broadcast %c0_i32 : i32 to vector<8x128xi32>
    %25 = arith.cmpi eq, %23, %24 : vector<8x128xi32>
    %c1_i32 = arith.constant 1 : i32
    %26 = vector.broadcast %c1_i32 : i32 to vector<8x128xi32>
    %27 = arith.cmpi eq, %23, %26 : vector<8x128xi32>
    %c2_i32 = arith.constant 2 : i32
    %28 = vector.broadcast %c2_i32 : i32 to vector<8x128xi32>
    %29 = arith.cmpi eq, %23, %28 : vector<8x128xi32>
    %cst_8 = arith.constant 0.000000e+00 : f32
    %30 = vector.shape_cast %22 : vector<8x1xf32> to vector<8x1xf32>
    %31 = vector.broadcast %30 : vector<8x1xf32> to vector<8x128xf32>
    %32 = vector.broadcast %cst_8 : f32 to vector<8x128xf32>
    %33 = arith.select %29, %31, %32 : vector<8x128xi1>, vector<8x128xf32>
    %34 = vector.shape_cast %18 : vector<8x1xf32> to vector<8x1xf32>
    %35 = vector.broadcast %34 : vector<8x1xf32> to vector<8x128xf32>
    %36 = arith.select %27, %35, %33 : vector<8x128xi1>, vector<8x128xf32>
    %37 = vector.shape_cast %14 : vector<8x1xf32> to vector<8x1xf32>
    %38 = vector.broadcast %37 : vector<8x1xf32> to vector<8x128xf32>
    %39 = arith.select %25, %38, %36 : vector<8x128xi1>, vector<8x128xf32>
    %c0_9 = arith.constant 0 : index
    %c0_10 = arith.constant 0 : index
    %40 = vector.load %arg3[%c0_9, %c0_10] : memref<8x128xf32, #tpu.memory_space<vmem>>, vector<8x128xf32>
    tpu.vector_store %arg3[%c0_9, %c0_10], %39 {strides = array<i32>} : memref<8x128xf32, #tpu.memory_space<vmem>>, vector<8x128xf32>,
    return
  }
  func.func @transform_0(%arg0: i32) -> (i32, i32) {
    %c0_i32 = arith.constant 0 : i32
    %c0_i32_0 = arith.constant 0 : i32
    return %arg0, %c0_i32 : i32, i32
  }
  func.func @transform_1(%arg0: i32) -> (i32, i32) {
    %c0_i32 = arith.constant 0 : i32
    %c0_i32_0 = arith.constant 0 : i32
    %c0_i32_1 = arith.constant 0 : i32
    return %c0_i32, %c0_i32_0 : i32, i32
  }
  func.func @transform_2(%arg0: i32) -> (i32, i32) {
    %c0_i32 = arith.constant 0 : i32
    %c0_i32_0 = arith.constant 0 : i32
    return %arg0, %c0_i32 : i32, i32
  }
}

module attributes {stable_mosaic.version = 11 : i64} {
  func.func @_integral_kernel(%arg0: i32, %arg1: memref<8x512xf32, #tpu.memory_space<vmem>>, %arg2: memref<8x512xf32, #tpu.memory_space<vmem>>, %arg3: memref<8x128xf32, #tpu.memory_space<vmem>>) attributes {dimension_semantics = [#tpu.dimension_semantics<parallel>], iteration_bounds = array<i64: 1>, scalar_prefetch = 0 : i64, scratch_operands = 0 : i64, tpu.core_type = #tpu.core_type<tc>, window_params = [{transform_indices = @transform_0, window_bounds = array<i64: 8, 512>}, {pipeline_mode = #tpu.pipeline_mode<synchronous>, transform_indices = @transform_1, window_bounds = array<i64: 8, 512>}, {transform_indices = @transform_2, window_bounds = array<i64: 8, 128>}]} {
    %c0 = arith.constant 0 : index
    %c0_0 = arith.constant 0 : index
    %0 = vector.load %arg1[%c0, %c0_0] : memref<8x512xf32, #tpu.memory_space<vmem>>, vector<8x512xf32>
    %cst = arith.constant dense<0xFF800000> : vector<8xf32>
    %1 = vector.multi_reduction <maximumf>, %0, %cst [1] : vector<8x512xf32> to vector<8xf32>
    %2 = vector.shape_cast %1 : vector<8xf32> to vector<8x1xf32>
    %3 = vector.broadcast %2 : vector<8x1xf32> to vector<8x512xf32>
    %4 = arith.subf %0, %3 : vector<8x512xf32>
    %5 = math.exp %4 : vector<8x512xf32>
    %c0_1 = arith.constant 0 : index
    %c0_2 = arith.constant 0 : index
    %6 = vector.load %arg2[%c0_1, %c0_2] : memref<8x512xf32, #tpu.memory_space<vmem>>, vector<8x512xf32>
    %cst_3 = arith.constant dense<0.000000e+00> : vector<8x8xf32>
    %7 = tpu.matmul %5, %6, %cst_3 {dimension_numbers = #tpu.dot_dimension_numbers<[1], [1], [0], [0], [0, 0, 1, 0], [], []>, precision = #tpu.contract_precision<fp32>} : vector<8x512xf32>, vector<8x512xf32>, vector<8x8xf32> -> vector<8x8xf32>
    %8 = vector.extract_strided_slice %7 {offsets = [0, 3], sizes = [8, 1], strides = [1, 1]} : vector<8x8xf32> to vector<8x1xf32>
    %cst_4 = arith.constant 1.000000e+00 : f32
    %9 = vector.broadcast %cst_4 : f32 to vector<8x1xf32>
    %10 = arith.divf %9, %8 : vector<8x1xf32>
    %11 = vector.extract_strided_slice %7 {offsets = [0, 0], sizes = [8, 1], strides = [1, 1]} : vector<8x8xf32> to vector<8x1xf32>
    %12 = arith.mulf %11, %10 : vector<8x1xf32>
    %cst_5 = arith.constant 5.000000e-01 : f32
    %13 = vector.broadcast %cst_5 : f32 to vector<8x1xf32>
    %14 = arith.subf %12, %13 : vector<8x1xf32>
    %15 = vector.extract_strided_slice %7 {offsets = [0, 1], sizes = [8, 1], strides = [1, 1]} : vector<8x8xf32> to vector<8x1xf32>
    %16 = arith.mulf %15, %10 : vector<8x1xf32>
    %cst_6 = arith.constant 5.000000e-01 : f32
    %17 = vector.broadcast %cst_6 : f32 to vector<8x1xf32>
    %18 = arith.subf %16, %17 : vector<8x1xf32>
    %19 = vector.extract_strided_slice %7 {offsets = [0, 2], sizes = [8, 1], strides = [1, 1]} : vector<8x8xf32> to vector<8x1xf32>
    %20 = arith.mulf %19, %10 : vector<8x1xf32>
    %cst_7 = arith.constant 5.000000e-01 : f32
    %21 = vector.broadcast %cst_7 : f32 to vector<8x1xf32>
    %22 = arith.subf %20, %21 : vector<8x1xf32>
    %23 = tpu.iota {dimensions = array<i32: 1>} : vector<8x128xi32>
    %c0_i32 = arith.constant 0 : i32
    %24 = vector.broadcast %c0_i32 : i32 to vector<8x128xi32>
    %25 = arith.cmpi eq, %23, %24 : vector<8x128xi32>
    %c1_i32 = arith.constant 1 : i32
    %26 = vector.broadcast %c1_i32 : i32 to vector<8x128xi32>
    %27 = arith.cmpi eq, %23, %26 : vector<8x128xi32>
    %c2_i32 = arith.constant 2 : i32
    %28 = vector.broadcast %c2_i32 : i32 to vector<8x128xi32>
    %29 = arith.cmpi eq, %23, %28 : vector<8x128xi32>
    %cst_8 = arith.constant 0.000000e+00 : f32
    %30 = vector.shape_cast %22 : vector<8x1xf32> to vector<8x1xf32>
    %31 = vector.broadcast %30 : vector<8x1xf32> to vector<8x128xf32>
    %32 = vector.broadcast %cst_8 : f32 to vector<8x128xf32>
    %33 = arith.select %29, %31, %32 : vector<8x128xi1>, vector<8x128xf32>
    %34 = vector.shape_cast %18 : vector<8x1xf32> to vector<8x1xf32>
    %35 = vector.broadcast %34 : vector<8x1xf32> to vector<8x128xf32>
    %36 = arith.select %27, %35, %33 : vector<8x128xi1>, vector<8x128xf32>
    %37 = vector.shape_cast %14 : vector<8x1xf32> to vector<8x1xf32>
    %38 = vector.broadcast %37 : vector<8x1xf32> to vector<8x128xf32>
    %39 = arith.select %25, %38, %36 : vector<8x128xi1>, vector<8x128xf32>
    %c0_9 = arith.constant 0 : index
    %c0_10 = arith.constant 0 : index
    %40 = vector.load %arg3[%c0_9, %c0_10] : memref<8x128xf32, #tpu.memory_space<vmem>>, vector<8x128xf32>
    tpu.vector_store %arg3[%c0_9, %c0_10], %39 {strides = array<i32>} : memref<8x128xf32, #tpu.memory_space<vmem>>, vector<8x128xf32>,
    return
  }
  func.func @transform_0(%arg0: i32) -> (i32, i32) {
    %c0_i32 = arith.constant 0 : i32
    %c0_i32_0 = arith.constant 0 : i32
    return %arg0, %c0_i32 : i32, i32
  }
  func.func @transform_1(%arg0: i32) -> (i32, i32) {
    %c0_i32 = arith.constant 0 : i32
    %c0_i32_0 = arith.constant 0 : i32
    %c0_i32_1 = arith.constant 0 : i32
    return %c0_i32, %c0_i32_0 : i32, i32
  }
  func.func @transform_2(%arg0: i32) -> (i32, i32) {
    %c0_i32 = arith.constant 0 : i32
    %c0_i32_0 = arith.constant 0 : i32
    return %arg0, %c0_i32 : i32, i32
  }
}

</mosaic_0001>

<bundles_post_ra>
// kernel: tpu_custom_call.1
= control target key start
LH: loop header
LB: loop body
LE: loop exit
PB: predicated region body
PF: predicated region fallthrough
CT: control target
= control target key end

     0   :  { %7 = vsyncpa [#allocation3], 0  ;;  %s1290_s0 = inlined_call_operand.hbm [shape: f32[8,512], index: 0, kind: input, shape index: {}]   ;;  %s1291_s1 = inlined_call_operand.hbm [shape: f32[8,512], index: 1, kind: input, shape index: {}]   ;;  %s1292_s2 = inlined_call_operand.hbm [shape: f32[8,128], index: 2, kind: output, shape index: {}]  }
   0x1   :  { %8 = vsyncpa [#allocation6], 0 }
   0x2   :  { %9 = vsyncpa [#allocation4], 0  ;;  %s1182_s9 = smov [#allocation2]   ;;  %s1183_s11 = smov [#allocation5]  }
   0x3   :  { %s16_s10 = sshll.u32 %s1182_s9, 4  ;;  %s26_s12 = sshll.u32 %s1183_s11, 4  ;;  %s17_s10 = int_to_ptr.vmem [resolvable:$true] %s16_s10  ;;  %s27_s12 = int_to_ptr.vmem [resolvable:$true] %s26_s12 }
   0x4   :  { %s1110_s15 = scalar_lea.hbm %s1290_s0, 512 }
   0x5   :  { %p1111_p0 = scmp.ne.s32.totalorder %s1290_s0, %s1110_s15  ;;  %p1114_p1 = scmp.lt.u32.totalorder %s1110_s15, %s1290_s0 }
   0x7   :  { %p1116_p2 = pnand %p1114_p1, %p1111_p0 }
   0x9   :  { %1119 = shalt.err (!%p1116_p2)
}
   0xa   :  { %s1120_s20 = scalar_lea.vmem %s17_s10, 512  ;;  %p1125_p4 = scmp.lt.s32.totalorder %s17_s10, %s17_s10 }
   0xb   :  { %p1121_p3 = scmp.ne.s32.totalorder %s17_s10, %s1120_s20  ;;  %p1126_p5 = scmp.lt.s32.totalorder %s1120_s20, %s1120_s20 }
   0xd   :  { %p1127_p6 = por %p1126_p5, %p1125_p4 }
   0xf   :  { %p1128_p7 = pnand %p1127_p6, %p1121_p3 }
  0x11   :  { %1131 = shalt.err (!%p1128_p7)
}
  0x12   :  { %19 = dma.hbm_to_vmem [thread:$0]  %s1290_s0, 512, %s17_s10, [#allocation3]  }
  0x13   :  { %s1132_s25 = scalar_lea.hbm %s1291_s1, 512 }
  0x14   :  { %p1133_p8 = scmp.ne.s32.totalorder %s1291_s1, %s1132_s25  ;;  %p1136_p9 = scmp.lt.u32.totalorder %s1132_s25, %s1291_s1 }
  0x16   :  { %p1138_p10 = pnand %p1136_p9, %p1133_p8 }
  0x18   :  { %1141 = shalt.err (!%p1138_p10)
}
  0x19   :  { %s1142_s30 = scalar_lea.vmem %s27_s12, 512  ;;  %p1147_p12 = scmp.lt.s32.totalorder %s27_s12, %s27_s12 }
  0x1a   :  { %p1143_p11 = scmp.ne.s32.totalorder %s27_s12, %s1142_s30  ;;  %p1148_p13 = scmp.lt.s32.totalorder %s1142_s30, %s1142_s30 }
  0x1c   :  { %p1149_p0 = por %p1148_p13, %p1147_p12 }
  0x1e   :  { %p1150_p1 = pnand %p1149_p0, %p1143_p11 }
  0x20   :  { %1153 = shalt.err (!%p1150_p1)
}
  0x21   :  { %29 = dma.hbm_to_vmem [thread:$0]  %s1291_s1, 512, %s27_s12, [#allocation6]  }
  0x22   :  { %1176 = dma.done.wait [#allocation3], 512  }
  0x23   :  { %1177 = vsyncadd [#allocation3], 4294966784 }
  0x24   :  { %1178 = dma.done.wait [#allocation6], 512  }
  0x25   :  { %1179 = vsyncadd [#allocation6], 4294966784  ;;  %v36_v0 = vld [vmem:[#allocation2] sm:$0xff]  ;;  %v37_v1 = vld [vmem:[#allocation2 + $0x8] sm:$0xff]  ;;  %s1186_s1 = smov 126   ;;  %s1187_s4 = smov 127  }
  0x26   :  { %v38_v2 = vld [vmem:[#allocation2 + $0x10] sm:$0xff]  ;;  %v39_v3 = vld [vmem:[#allocation2 + $0x18] sm:$0xff]  ;;  %v40_v4 = vmax.f32 %v36_v0, %v37_v1  ;;  %v58_v7 = vld [vmem:[#allocation5 + $0x8] sm:$0xff]  ;;  %s1188_s5 = smov 125   ;;  %s1190_s6 = smov [#allocation7]  }
  0x27   :  { %v41_v5 = vmax.f32 %v38_v2, %v39_v3  ;;  %v60_v8 = vld [vmem:[#allocation5 + $0x18] sm:$0xff]  ;;  %v57_v9 = vld [vmem:[#allocation5] sm:$0xff]  ;;  %v1230_v10 = vand.u32 4294901760, %v58_v7  ;;  %v59_v13 = vld [vmem:[#allocation5 + $0x10] sm:$0xff]  ;;  %s1053_s7 = sshll.u32 %s1190_s6, 4  ;;  %s1054_s7 = int_to_ptr.vmem [resolvable:$true] %s1053_s7 }
  0x28   :  { %v1232_v11 = vand.u32 4294901760, %v60_v8  ;;  %v1234_v12 = vand.u32 4294901760, %v57_v9  ;;  %v1236_v14 = vand.u32 4294901760, %v59_v13  ;;  %s1154_s8 = scalar_lea.vmem %s1054_s7, 128  ;;  %p1159_p3 = scmp.lt.s32.totalorder %s1054_s7, %s1054_s7 }
  0x29   :  { %v42_v6 = vmax.f32 %v40_v4, %v41_v5  ;;  %62 = vmatprep.subr.mxu1 %v1230_v10  ;;  %v1243_v15 = vsub.f32 %v58_v7, %v1230_v10  ;;  %v1184_v5 = vmov 2   ;;  %p1155_p2 = scmp.ne.s32.totalorder %s1054_s7, %s1154_s8  ;;  %p1160_p4 = scmp.lt.s32.totalorder %s1154_s8, %s1154_s8 }
  0x2a   :  { %534 = vmatprep.subr.mxu0 %v1232_v11  ;;  %64 = vmatpush1.xpose.msra.mxu1 %v1234_v12  ;;  %v1246_v16 = vsub.f32 %v60_v8, %v1232_v11  ;;  %v150_v32 = vsub.f32 %v57_v9, %v1234_v12  ;;  %v622_v34 = vsub.f32 %v59_v13, %v1236_v14 }
  0x2b   :  { %43 = vmax.xlane.f32.xlu0 %v42_v6  ;;  %536 = vmatpush1.xpose.msra.mxu0 %v1236_v14  ;;  %v145_v17 = vand.u32 4294901760, %v1243_v15  ;;  %v1185_v6 = vmov 0   ;;  %p1161_p5 = por %p1160_p4, %p1159_p3 }
  0x2c   :  { %v617_v18 = vand.u32 4294901760, %v1246_v16  ;;  %v151_v39 = vand.u32 4294901760, %v150_v32  ;;  %v623_v45 = vand.u32 4294901760, %v622_v34  ;;  %1096 = vset.pattern.permute.xlu1 %v1184_v5  ;;  %1099 = vset.pattern.permute.xlu0 %v1185_v6 }
  0x2d   :  { %v146_v19 = vsub.f32 %v1243_v15, %v145_v17  ;;  %p1162_p6 = pnand %p1161_p5, %p1155_p2 }
  0x2e   :  { %v618_v20 = vsub.f32 %v1246_v16, %v617_v18  ;;  %v152_v50 = vsub.f32 %v150_v32, %v151_v39  ;;  %v624_v55 = vsub.f32 %v622_v34, %v623_v45 }
  0x2f   :  { %v147_v21 = vand.u32 4294901760, %v146_v19 }
  0x30   :  { %v619_v22 = vand.u32 4294901760, %v618_v20  ;;  %v153_v60 = vand.u32 4294901760, %v152_v50  ;;  %v625_v63 = vand.u32 4294901760, %v624_v55 }
  0x31   :  { %148 = vmatprep.subr.mxu1 %v147_v21 }
  0x32   :  { %620 = vmatprep.subr.mxu0 %v619_v22 }
  0xb8   :  { %v44_v23 = vpop.xlane.xlu0 %43 }
  0xb9   :  { %v45_v24 = vsub.f32 %v36_v0, %v44_v23  ;;  %v46_v25 = vsub.f32 %v37_v1, %v44_v23  ;;  %v47_v26 = vsub.f32 %v38_v2, %v44_v23  ;;  %v48_v27 = vsub.f32 %v39_v3, %v44_v23 }
  0xbb   :  { %v49_v28 = vmul.f32 1.442695, %v45_v24  ;;  %v51_v29 = vmul.f32 1.442695, %v46_v25  ;;  %v53_v30 = vmul.f32 1.442695, %v47_v26 }
  0xbc   :  { %v55_v31 = vmul.f32 1.442695, %v48_v27 }
  0xbd   :  { %1100 = vpow2.f32 %v49_v28 }
  0xbe   :  { %1102 = vpow2.f32 %v51_v29 }
  0xbf   :  { %1104 = vpow2.f32 %v53_v30 }
  0xc0   :  { %1106 = vpow2.f32 %v55_v31 }
  0xc7   :  { %v1101_v33 = vpop.eup %1100 }
  0xc8   :  { %v1103_v35 = vpop.eup %1102  ;;  %v1258_v36 = vand.u32 4294901760, %v1101_v33 }
  0xc9   :  { %v1105_v37 = vpop.eup %1104  ;;  %v127_v38 = vand.u32 4294901760, %v1103_v35 }
  0xca   :  { %v1107_v40 = vpop.eup %1106  ;;  %v134_v41 = vsub.f32 %v1101_v33, %v1258_v36  ;;  %v605_v42 = vand.u32 4294901760, %v1105_v37 }
  0xcb   :  { %v128_v43 = vsub.f32 %v1103_v35, %v127_v38  ;;  %v599_v44 = vand.u32 4294901760, %v1107_v40 }
  0xcc   :  { %v135_v46 = vand.u32 4294901760, %v134_v41  ;;  %v606_v47 = vsub.f32 %v1105_v37, %v605_v42 }
  0xcd   :  { %v129_v48 = vand.u32 4294901760, %v128_v43  ;;  %v600_v49 = vsub.f32 %v1107_v40, %v599_v44 }
  0xce   :  { %v136_v51 = vsub.f32 %v134_v41, %v135_v46  ;;  %v607_v52 = vand.u32 4294901760, %v606_v47 }
  0xcf   :  { %v130_v53 = vsub.f32 %v128_v43, %v129_v48  ;;  %v601_v54 = vand.u32 4294901760, %v600_v49 }
  0xd0   :  { %v137_v56 = vand.u32 4294901760, %v136_v51  ;;  %v608_v57 = vsub.f32 %v606_v47, %v607_v52 }
  0xd1   :  { %v131_v58 = vand.u32 4294901760, %v130_v53  ;;  %v602_v59 = vsub.f32 %v600_v49, %v601_v54 }
  0xd2   :  { %v609_v61 = vand.u32 4294901760, %v608_v57 }
  0xd3   :  { %132 = vmatprep.mubr.f32.mxu1 %v131_v58  ;;  %v603_v62 = vand.u32 4294901760, %v602_v59 }
  0xd4   :  { %138 = vmatmul.mubr.f32.vlgmr.msra.gmra.mrb[0].mxu1 %v137_v56 }
  0xd5   :  { %604 = vmatprep.mubr.f32.mxu0 %v603_v62  ;;  %154 = vmatpush1.xpose.msra.mxu1 %v153_v60 }
  0xd6   :  { %610 = vmatmul.mubr.f32.vlgmr.msra.gmra.mrb[0].mxu0 %v609_v61  ;;  %218 = vmatprep.mubr.f32.mxu1 %v127_v38 }
  0xd7   :  { %626 = vmatpush1.xpose.msra.mxu0 %v625_v63  ;;  %690 = vmatprep.mubr.f32.mxu0 %v599_v44 }
  0xd8   :  { %227 = vmatprep.subr.mxu1 %v1243_v15  ;;  %699 = vmatprep.subr.mxu0 %v1246_v16  ;;  %v1189_v16 = vmov 1  }
  0xdc   :  { %220 = vmatmul.mubr.f32.vlgmr.msra.gmra.mrb[0].mxu1 %v1258_v36 }
  0xdd   :  { %230 = vmatpush1.xpose.msra.mxu1 %v150_v32  ;;  %295 = vmatprep.mubr.f32.mxu1 %v128_v43 }
  0xde   :  { %692 = vmatmul.mubr.f32.vlgmr.msra.gmra.mrb[0].mxu0 %v605_v42  ;;  %304 = vmatprep.subr.mxu1 %v1230_v10 }
  0xdf   :  { %702 = vmatpush1.xpose.msra.mxu0 %v622_v34  ;;  %767 = vmatprep.mubr.f32.mxu0 %v600_v49 }
  0xe0   :  { %776 = vmatprep.subr.mxu0 %v1232_v11 }
  0xe4   :  { %298 = vmatmul.mubr.f32.vlgmr.msra.gmra.mrb[0].mxu1 %v134_v41 }
  0xe5   :  { %306 = vmatpush1.xpose.msra.mxu1 %v1234_v12  ;;  %372 = vmatprep.mubr.f32.mxu1 %v129_v48 }
  0xe6   :  { %770 = vmatmul.mubr.f32.vlgmr.msra.gmra.mrb[0].mxu0 %v606_v47  ;;  %384 = vmatprep.subr.mxu1 %v145_v17 }
  0xe7   :  { %778 = vmatpush1.xpose.msra.mxu0 %v1236_v14  ;;  %844 = vmatprep.mubr.f32.mxu0 %v601_v54 }
  0xe8   :  { %856 = vmatprep.subr.mxu0 %v617_v18  ;;  %v1023_v18 = vlaneseq }
  0xea   :  { %v1024_v20 = vand.u32 127, %v1023_v18 }
  0xec   :  { %376 = vmatmul.mubr.f32.vlgmr.msra.gmra.mrb[0].mxu1 %v135_v46  ;;  %vm1027_vm0 = vcmp.eq.s32.totalorder %v1024_v20, 2  ;;  %vm1026_vm1 = vcmp.eq.s32.totalorder %v1024_v20, 1  ;;  %vm1025_vm2 = vcmp.eq.s32.totalorder %v1024_v20, 0 }
  0xed   :  { %388 = vmatpush1.xpose.msra.mxu1 %v151_v39  ;;  %452 = vmatprep.mubr.f32.mxu1 %v127_v38 }
  0xee   :  { %848 = vmatmul.mubr.f32.vlgmr.msra.gmra.mrb[0].mxu0 %v607_v52  ;;  %460 = vmatprep.subr.mxu1 %v1230_v10 }
  0xef   :  { %860 = vmatpush1.xpose.msra.mxu0 %v623_v45  ;;  %924 = vmatprep.mubr.f32.mxu0 %v599_v44 }
  0xf0   :  { %932 = vmatprep.subr.mxu0 %v1232_v11 }
  0xf4   :  { %454 = vmatmul.mubr.f32.vlgmr.msra.gmra.mrb[0].mxu1 %v1258_v36 }
  0xf5   :  { %462 = vmatpush1.xpose.msra.mxu1 %v1234_v12  ;;  %526 = vmatprep.mubr.f32.mxu1 %v127_v38 }
  0xf6   :  { %926 = vmatmul.mubr.f32.vlgmr.msra.gmra.mrb[0].mxu0 %v605_v42 }
  0xf7   :  { %934 = vmatpush1.xpose.msra.mxu0 %v1236_v14  ;;  %998 = vmatprep.mubr.f32.mxu0 %v599_v44 }
  0xfc   :  { %528 = vmatmul.mubr.f32.vlgmr.msra.gmra.mrb[0].mxu1 %v1258_v36 }
  0xfe   :  { %1000 = vmatmul.mubr.f32.vlgmr.msra.gmra.mrb[0].mxu0 %v605_v42 }
 0x1cf   :  { %v529_v0 = vpop.f32.mrb[0].mxu1 }
 0x1d0   :  { %v531_v1 = vpop.f32.mrb[1].mxu1 }
 0x1d1   :  { %v1001_v2 = vpop.f32.mrb[0].mxu0 }
 0x1d2   :  { %v1066_v3 = vadd.f32 %v1001_v2, %v529_v0  ;;  %v1003_v4 = vpop.f32.mrb[1].mxu0 }
 0x1d4   :  { %1108 = vrcp.f32 %v1066_v3 }
 0x1de   :  { %v1109_v7 = vpop.eup %1108 }
 0x1df   :  { %1013 = vrot.lane.b32.xlu1 %v1109_v7, %s1186_s1  ;;  %1018 = vrot.lane.b32.xlu0 %v1109_v7, %s1187_s4 }
 0x1e3   :  { %1008 = vrot.lane.b32.xlu1 %v1109_v7, %s1188_s5 }
 0x251   :  { %v1014_v8 = vpop.permute.xlu1 %1013  ;;  %v1019_v9 = vpop.permute.xlu0 %1018 }
 0x252   :  { %v1021_v10 = vmul.f32 %v1066_v3, %v1019_v9  ;;  %v1016_v12 = vmul.f32 %v1066_v3, %v1014_v8 }
 0x254   :  { %v1065_v11 = vadd.f32 -0.5, %v1021_v10  ;;  %v1064_v14 = vadd.f32 -0.5, %v1016_v12 }
 0x255   :  { %v1009_v13 = vpop.permute.xlu1 %1008 }
 0x256   :  { %1030 = vperm.xlu1 %1096, %v1065_v11   ;;  %v1011_v15 = vmul.f32 %v1066_v3, %v1009_v13 }
 0x258   :  { %v1063_v17 = vadd.f32 -0.5, %v1011_v15 }
 0x25a   :  { %1097 = vset.pattern.permute.xlu1 %v1189_v16 }
 0x25b   :  { %1036 = vperm.xlu1 %1097, %v1064_v14  }
 0x25f   :  { %1098 = vset.pattern.permute.xlu1 %v1185_v6 }
 0x260   :  { %1042 = vperm.xlu1 %1098, %v1063_v17  }
 0x2d5   :  { %v1031_v19 = vpop.permute.xlu1 %1030 }
 0x2d6   :  { %v1033_v22 = vsel %vm1027_vm0, %v1031_v19, 0.0 }
 0x2da   :  { %v1037_v21 = vpop.permute.xlu1 %1036 }
 0x2db   :  { %v1039_v23 = vsel %vm1026_vm1, %v1037_v21, %v1033_v22 }
 0x2df   :  { %v1043_v24 = vpop.permute.xlu1 %1042 }
 0x2e0   :  { %v1045_v25 = vsel %vm1025_vm2, %v1043_v24, %v1039_v23 }
 0x2e1   :  { %1046 = vst [vmem:[#allocation7] sm:$0xff] %v1045_v25 }
 0x2e2   :  { %1165 = shalt.err (!%p1162_p6)
}
 0x2e3   :  { %s1166_s11 = scalar_lea.hbm %s1292_s2, 128 }
 0x2e4   :  { %p1167_p7 = scmp.ne.s32.totalorder %s1292_s2, %s1166_s11  ;;  %p1170_p8 = scmp.lt.u32.totalorder %s1166_s11, %s1292_s2 }
 0x2e6   :  { %p1172_p9 = pnand %p1170_p8, %p1167_p7 }
 0x2e8   :  { %1175 = shalt.err (!%p1172_p9)
}
 0x2e9   :  { %1056 = dma.vmem_to_hbm [thread:$0]  %s1054_s7, 128, %s1292_s2, [#allocation4]  }
 0x2ea   :  { %1180 = dma.done.wait [#allocation4], 128  }
 0x2eb   :  { %1181 = vsyncadd [#allocation4], 4294967168 }
 0x2ec   :  { %1060 = vsyncpa [#allocation3], 1 }
 0x2ed   :  { %1061 = vsyncpa [#allocation6], 1 }
 0x2ee   :  { %1062 = vsyncpa [#allocation4], 1 }

// kernel: tpu_custom_call.1
= control target key start
LH: loop header
LB: loop body
LE: loop exit
PB: predicated region body
PF: predicated region fallthrough
CT: control target
= control target key end

     0   :  { %7 = vsyncpa [#allocation3], 0  ;;  %s1290_s0 = inlined_call_operand.hbm [shape: f32[8,512], index: 0, kind: input, shape index: {}]   ;;  %s1291_s1 = inlined_call_operand.hbm [shape: f32[8,512], index: 1, kind: input, shape index: {}]   ;;  %s1292_s2 = inlined_call_operand.hbm [shape: f32[8,128], index: 2, kind: output, shape index: {}]  }
   0x1   :  { %8 = vsyncpa [#allocation6], 0 }
   0x2   :  { %9 = vsyncpa [#allocation4], 0  ;;  %s1182_s9 = smov [#allocation2]   ;;  %s1183_s11 = smov [#allocation5]  }
   0x3   :  { %s16_s10 = sshll.u32 %s1182_s9, 4  ;;  %s26_s12 = sshll.u32 %s1183_s11, 4  ;;  %s17_s10 = int_to_ptr.vmem [resolvable:$true] %s16_s10  ;;  %s27_s12 = int_to_ptr.vmem [resolvable:$true] %s26_s12 }
   0x4   :  { %s1110_s15 = scalar_lea.hbm %s1290_s0, 512 }
   0x5   :  { %p1111_p0 = scmp.ne.s32.totalorder %s1290_s0, %s1110_s15  ;;  %p1114_p1 = scmp.lt.u32.totalorder %s1110_s15, %s1290_s0 }
   0x7   :  { %p1116_p2 = pnand %p1114_p1, %p1111_p0 }
   0x9   :  { %1119 = shalt.err (!%p1116_p2)
}
   0xa   :  { %s1120_s20 = scalar_lea.vmem %s17_s10, 512  ;;  %p1125_p4 = scmp.lt.s32.totalorder %s17_s10, %s17_s10 }
   0xb   :  { %p1121_p3 = scmp.ne.s32.totalorder %s17_s10, %s1120_s20  ;;  %p1126_p5 = scmp.lt.s32.totalorder %s1120_s20, %s1120_s20 }
   0xd   :  { %p1127_p6 = por %p1126_p5, %p1125_p4 }
   0xf   :  { %p1128_p7 = pnand %p1127_p6, %p1121_p3 }
  0x11   :  { %1131 = shalt.err (!%p1128_p7)
}
  0x12   :  { %19 = dma.hbm_to_vmem [thread:$0]  %s1290_s0, 512, %s17_s10, [#allocation3]  }
  0x13   :  { %s1132_s25 = scalar_lea.hbm %s1291_s1, 512 }
  0x14   :  { %p1133_p8 = scmp.ne.s32.totalorder %s1291_s1, %s1132_s25  ;;  %p1136_p9 = scmp.lt.u32.totalorder %s1132_s25, %s1291_s1 }
  0x16   :  { %p1138_p10 = pnand %p1136_p9, %p1133_p8 }
  0x18   :  { %1141 = shalt.err (!%p1138_p10)
}
  0x19   :  { %s1142_s30 = scalar_lea.vmem %s27_s12, 512  ;;  %p1147_p12 = scmp.lt.s32.totalorder %s27_s12, %s27_s12 }
  0x1a   :  { %p1143_p11 = scmp.ne.s32.totalorder %s27_s12, %s1142_s30  ;;  %p1148_p13 = scmp.lt.s32.totalorder %s1142_s30, %s1142_s30 }
  0x1c   :  { %p1149_p0 = por %p1148_p13, %p1147_p12 }
  0x1e   :  { %p1150_p1 = pnand %p1149_p0, %p1143_p11 }
  0x20   :  { %1153 = shalt.err (!%p1150_p1)
}
  0x21   :  { %29 = dma.hbm_to_vmem [thread:$0]  %s1291_s1, 512, %s27_s12, [#allocation6]  }
  0x22   :  { %1176 = dma.done.wait [#allocation3], 512  }
  0x23   :  { %1177 = vsyncadd [#allocation3], 4294966784 }
  0x24   :  { %1178 = dma.done.wait [#allocation6], 512  }
  0x25   :  { %1179 = vsyncadd [#allocation6], 4294966784  ;;  %v36_v0 = vld [vmem:[#allocation2] sm:$0xff]  ;;  %v37_v1 = vld [vmem:[#allocation2 + $0x8] sm:$0xff]  ;;  %s1186_s1 = smov 126   ;;  %s1187_s4 = smov 127  }
  0x26   :  { %v38_v2 = vld [vmem:[#allocation2 + $0x10] sm:$0xff]  ;;  %v39_v3 = vld [vmem:[#allocation2 + $0x18] sm:$0xff]  ;;  %v40_v4 = vmax.f32 %v36_v0, %v37_v1  ;;  %v58_v7 = vld [vmem:[#allocation5 + $0x8] sm:$0xff]  ;;  %s1188_s5 = smov 125   ;;  %s1190_s6 = smov [#allocation7]  }
  0x27   :  { %v41_v5 = vmax.f32 %v38_v2, %v39_v3  ;;  %v60_v8 = vld [vmem:[#allocation5 + $0x18] sm:$0xff]  ;;  %v57_v9 = vld [vmem:[#allocation5] sm:$0xff]  ;;  %v1230_v10 = vand.u32 4294901760, %v58_v7  ;;  %v59_v13 = vld [vmem:[#allocation5 + $0x10] sm:$0xff]  ;;  %s1053_s7 = sshll.u32 %s1190_s6, 4  ;;  %s1054_s7 = int_to_ptr.vmem [resolvable:$true] %s1053_s7 }
  0x28   :  { %v1232_v11 = vand.u32 4294901760, %v60_v8  ;;  %v1234_v12 = vand.u32 4294901760, %v57_v9  ;;  %v1236_v14 = vand.u32 4294901760, %v59_v13  ;;  %s1154_s8 = scalar_lea.vmem %s1054_s7, 128  ;;  %p1159_p3 = scmp.lt.s32.totalorder %s1054_s7, %s1054_s7 }
  0x29   :  { %v42_v6 = vmax.f32 %v40_v4, %v41_v5  ;;  %62 = vmatprep.subr.mxu1 %v1230_v10  ;;  %v1243_v15 = vsub.f32 %v58_v7, %v1230_v10  ;;  %v1184_v5 = vmov 2   ;;  %p1155_p2 = scmp.ne.s32.totalorder %s1054_s7, %s1154_s8  ;;  %p1160_p4 = scmp.lt.s32.totalorder %s1154_s8, %s1154_s8 }
  0x2a   :  { %534 = vmatprep.subr.mxu0 %v1232_v11  ;;  %64 = vmatpush1.xpose.msra.mxu1 %v1234_v12  ;;  %v1246_v16 = vsub.f32 %v60_v8, %v1232_v11  ;;  %v150_v32 = vsub.f32 %v57_v9, %v1234_v12  ;;  %v622_v34 = vsub.f32 %v59_v13, %v1236_v14 }
  0x2b   :  { %43 = vmax.xlane.f32.xlu0 %v42_v6  ;;  %536 = vmatpush1.xpose.msra.mxu0 %v1236_v14  ;;  %v145_v17 = vand.u32 4294901760, %v1243_v15  ;;  %v1185_v6 = vmov 0   ;;  %p1161_p5 = por %p1160_p4, %p1159_p3 }
  0x2c   :  { %v617_v18 = vand.u32 4294901760, %v1246_v16  ;;  %v151_v39 = vand.u32 4294901760, %v150_v32  ;;  %v623_v45 = vand.u32 4294901760, %v622_v34  ;;  %1096 = vset.pattern.permute.xlu1 %v1184_v5  ;;  %1099 = vset.pattern.permute.xlu0 %v1185_v6 }
  0x2d   :  { %v146_v19 = vsub.f32 %v1243_v15, %v145_v17  ;;  %p1162_p6 = pnand %p1161_p5, %p1155_p2 }
  0x2e   :  { %v618_v20 = vsub.f32 %v1246_v16, %v617_v18  ;;  %v152_v50 = vsub.f32 %v150_v32, %v151_v39  ;;  %v624_v55 = vsub.f32 %v622_v34, %v623_v45 }
  0x2f   :  { %v147_v21 = vand.u32 4294901760, %v146_v19 }
  0x30   :  { %v619_v22 = vand.u32 4294901760, %v618_v20  ;;  %v153_v60 = vand.u32 4294901760, %v152_v50  ;;  %v625_v63 = vand.u32 4294901760, %v624_v55 }
  0x31   :  { %148 = vmatprep.subr.mxu1 %v147_v21 }
  0x32   :  { %620 = vmatprep.subr.mxu0 %v619_v22 }
  0xb8   :  { %v44_v23 = vpop.xlane.xlu0 %43 }
  0xb9   :  { %v45_v24 = vsub.f32 %v36_v0, %v44_v23  ;;  %v46_v25 = vsub.f32 %v37_v1, %v44_v23  ;;  %v47_v26 = vsub.f32 %v38_v2, %v44_v23  ;;  %v48_v27 = vsub.f32 %v39_v3, %v44_v23 }
  0xbb   :  { %v49_v28 = vmul.f32 1.442695, %v45_v24  ;;  %v51_v29 = vmul.f32 1.442695, %v46_v25  ;;  %v53_v30 = vmul.f32 1.442695, %v47_v26 }
  0xbc   :  { %v55_v31 = vmul.f32 1.442695, %v48_v27 }
  0xbd   :  { %1100 = vpow2.f32 %v49_v28 }
  0xbe   :  { %1102 = vpow2.f32 %v51_v29 }
  0xbf   :  { %1104 = vpow2.f32 %v53_v30 }
  0xc0   :  { %1106 = vpow2.f32 %v55_v31 }
  0xc7   :  { %v1101_v33 = vpop.eup %1100 }
  0xc8   :  { %v1103_v35 = vpop.eup %1102  ;;  %v1258_v36 = vand.u32 4294901760, %v1101_v33 }
  0xc9   :  { %v1105_v37 = vpop.eup %1104  ;;  %v127_v38 = vand.u32 4294901760, %v1103_v35 }
  0xca   :  { %v1107_v40 = vpop.eup %1106  ;;  %v134_v41 = vsub.f32 %v1101_v33, %v1258_v36  ;;  %v605_v42 = vand.u32 4294901760, %v1105_v37 }
  0xcb   :  { %v128_v43 = vsub.f32 %v1103_v35, %v127_v38  ;;  %v599_v44 = vand.u32 4294901760, %v1107_v40 }
  0xcc   :  { %v135_v46 = vand.u32 4294901760, %v134_v41  ;;  %v606_v47 = vsub.f32 %v1105_v37, %v605_v42 }
  0xcd   :  { %v129_v48 = vand.u32 4294901760, %v128_v43  ;;  %v600_v49 = vsub.f32 %v1107_v40, %v599_v44 }
  0xce   :  { %v136_v51 = vsub.f32 %v134_v41, %v135_v46  ;;  %v607_v52 = vand.u32 4294901760, %v606_v47 }
  0xcf   :  { %v130_v53 = vsub.f32 %v128_v43, %v129_v48  ;;  %v601_v54 = vand.u32 4294901760, %v600_v49 }
  0xd0   :  { %v137_v56 = vand.u32 4294901760, %v136_v51  ;;  %v608_v57 = vsub.f32 %v606_v47, %v607_v52 }
  0xd1   :  { %v131_v58 = vand.u32 4294901760, %v130_v53  ;;  %v602_v59 = vsub.f32 %v600_v49, %v601_v54 }
  0xd2   :  { %v609_v61 = vand.u32 4294901760, %v608_v57 }
  0xd3   :  { %132 = vmatprep.mubr.f32.mxu1 %v131_v58  ;;  %v603_v62 = vand.u32 4294901760, %v602_v59 }
  0xd4   :  { %138 = vmatmul.mubr.f32.vlgmr.msra.gmra.mrb[0].mxu1 %v137_v56 }
  0xd5   :  { %604 = vmatprep.mubr.f32.mxu0 %v603_v62  ;;  %154 = vmatpush1.xpose.msra.mxu1 %v153_v60 }
  0xd6   :  { %610 = vmatmul.mubr.f32.vlgmr.msra.gmra.mrb[0].mxu0 %v609_v61  ;;  %218 = vmatprep.mubr.f32.mxu1 %v127_v38 }
  0xd7   :  { %626 = vmatpush1.xpose.msra.mxu0 %v625_v63  ;;  %690 = vmatprep.mubr.f32.mxu0 %v599_v44 }
  0xd8   :  { %227 = vmatprep.subr.mxu1 %v1243_v15  ;;  %699 = vmatprep.subr.mxu0 %v1246_v16  ;;  %v1189_v16 = vmov 1  }
  0xdc   :  { %220 = vmatmul.mubr.f32.vlgmr.msra.gmra.mrb[0].mxu1 %v1258_v36 }
  0xdd   :  { %230 = vmatpush1.xpose.msra.mxu1 %v150_v32  ;;  %295 = vmatprep.mubr.f32.mxu1 %v128_v43 }
  0xde   :  { %692 = vmatmul.mubr.f32.vlgmr.msra.gmra.mrb[0].mxu0 %v605_v42  ;;  %304 = vmatprep.subr.mxu1 %v1230_v10 }
  0xdf   :  { %702 = vmatpush1.xpose.msra.mxu0 %v622_v34  ;;  %767 = vmatprep.mubr.f32.mxu0 %v600_v49 }
  0xe0   :  { %776 = vmatprep.subr.mxu0 %v1232_v11 }
  0xe4   :  { %298 = vmatmul.mubr.f32.vlgmr.msra.gmra.mrb[0].mxu1 %v134_v41 }
  0xe5   :  { %306 = vmatpush1.xpose.msra.mxu1 %v1234_v12  ;;  %372 = vmatprep.mubr.f32.mxu1 %v129_v48 }
  0xe6   :  { %770 = vmatmul.mubr.f32.vlgmr.msra.gmra.mrb[0].mxu0 %v606_v47  ;;  %384 = vmatprep.subr.mxu1 %v145_v17 }
  0xe7   :  { %778 = vmatpush1.xpose.msra.mxu0 %v1236_v14  ;;  %844 = vmatprep.mubr.f32.mxu0 %v601_v54 }
  0xe8   :  { %856 = vmatprep.subr.mxu0 %v617_v18  ;;  %v1023_v18 = vlaneseq }
  0xea   :  { %v1024_v20 = vand.u32 127, %v1023_v18 }
  0xec   :  { %376 = vmatmul.mubr.f32.vlgmr.msra.gmra.mrb[0].mxu1 %v135_v46  ;;  %vm1027_vm0 = vcmp.eq.s32.totalorder %v1024_v20, 2  ;;  %vm1026_vm1 = vcmp.eq.s32.totalorder %v1024_v20, 1  ;;  %vm1025_vm2 = vcmp.eq.s32.totalorder %v1024_v20, 0 }
  0xed   :  { %388 = vmatpush1.xpose.msra.mxu1 %v151_v39  ;;  %452 = vmatprep.mubr.f32.mxu1 %v127_v38 }
  0xee   :  { %848 = vmatmul.mubr.f32.vlgmr.msra.gmra.mrb[0].mxu0 %v607_v52  ;;  %460 = vmatprep.subr.mxu1 %v1230_v10 }
  0xef   :  { %860 = vmatpush1.xpose.msra.mxu0 %v623_v45  ;;  %924 = vmatprep.mubr.f32.mxu0 %v599_v44 }
  0xf0   :  { %932 = vmatprep.subr.mxu0 %v1232_v11 }
  0xf4   :  { %454 = vmatmul.mubr.f32.vlgmr.msra.gmra.mrb[0].mxu1 %v1258_v36 }
  0xf5   :  { %462 = vmatpush1.xpose.msra.mxu1 %v1234_v12  ;;  %526 = vmatprep.mubr.f32.mxu1 %v127_v38 }
  0xf6   :  { %926 = vmatmul.mubr.f32.vlgmr.msra.gmra.mrb[0].mxu0 %v605_v42 }
  0xf7   :  { %934 = vmatpush1.xpose.msra.mxu0 %v1236_v14  ;;  %998 = vmatprep.mubr.f32.mxu0 %v599_v44 }
  0xfc   :  { %528 = vmatmul.mubr.f32.vlgmr.msra.gmra.mrb[0].mxu1 %v1258_v36 }
  0xfe   :  { %1000 = vmatmul.mubr.f32.vlgmr.msra.gmra.mrb[0].mxu0 %v605_v42 }
 0x1cf   :  { %v529_v0 = vpop.f32.mrb[0].mxu1 }
 0x1d0   :  { %v531_v1 = vpop.f32.mrb[1].mxu1 }
 0x1d1   :  { %v1001_v2 = vpop.f32.mrb[0].mxu0 }
 0x1d2   :  { %v1066_v3 = vadd.f32 %v1001_v2, %v529_v0  ;;  %v1003_v4 = vpop.f32.mrb[1].mxu0 }
 0x1d4   :  { %1108 = vrcp.f32 %v1066_v3 }
 0x1de   :  { %v1109_v7 = vpop.eup %1108 }
 0x1df   :  { %1013 = vrot.lane.b32.xlu1 %v1109_v7, %s1186_s1  ;;  %1018 = vrot.lane.b32.xlu0 %v1109_v7, %s1187_s4 }
 0x1e3   :  { %1008 = vrot.lane.b32.xlu1 %v1109_v7, %s1188_s5 }
 0x251   :  { %v1014_v8 = vpop.permute.xlu1 %1013  ;;  %v1019_v9 = vpop.permute.xlu0 %1018 }
 0x252   :  { %v1021_v10 = vmul.f32 %v1066_v3, %v1019_v9  ;;  %v1016_v12 = vmul.f32 %v1066_v3, %v1014_v8 }
 0x254   :  { %v1065_v11 = vadd.f32 -0.5, %v1021_v10  ;;  %v1064_v14 = vadd.f32 -0.5, %v1016_v12 }
 0x255   :  { %v1009_v13 = vpop.permute.xlu1 %1008 }
 0x256   :  { %1030 = vperm.xlu1 %1096, %v1065_v11   ;;  %v1011_v15 = vmul.f32 %v1066_v3, %v1009_v13 }
 0x258   :  { %v1063_v17 = vadd.f32 -0.5, %v1011_v15 }
 0x25a   :  { %1097 = vset.pattern.permute.xlu1 %v1189_v16 }
 0x25b   :  { %1036 = vperm.xlu1 %1097, %v1064_v14  }
 0x25f   :  { %1098 = vset.pattern.permute.xlu1 %v1185_v6 }
 0x260   :  { %1042 = vperm.xlu1 %1098, %v1063_v17  }
 0x2d5   :  { %v1031_v19 = vpop.permute.xlu1 %1030 }
 0x2d6   :  { %v1033_v22 = vsel %vm1027_vm0, %v1031_v19, 0.0 }
 0x2da   :  { %v1037_v21 = vpop.permute.xlu1 %1036 }
 0x2db   :  { %v1039_v23 = vsel %vm1026_vm1, %v1037_v21, %v1033_v22 }
 0x2df   :  { %v1043_v24 = vpop.permute.xlu1 %1042 }
 0x2e0   :  { %v1045_v25 = vsel %vm1025_vm2, %v1043_v24, %v1039_v23 }
 0x2e1   :  { %1046 = vst [vmem:[#allocation7] sm:$0xff] %v1045_v25 }
 0x2e2   :  { %1165 = shalt.err (!%p1162_p6)
}
 0x2e3   :  { %s1166_s11 = scalar_lea.hbm %s1292_s2, 128 }
 0x2e4   :  { %p1167_p7 = scmp.ne.s32.totalorder %s1292_s2, %s1166_s11  ;;  %p1170_p8 = scmp.lt.u32.totalorder %s1166_s11, %s1292_s2 }
 0x2e6   :  { %p1172_p9 = pnand %p1170_p8, %p1167_p7 }
 0x2e8   :  { %1175 = shalt.err (!%p1172_p9)
}
 0x2e9   :  { %1056 = dma.vmem_to_hbm [thread:$0]  %s1054_s7, 128, %s1292_s2, [#allocation4]  }
 0x2ea   :  { %1180 = dma.done.wait [#allocation4], 128  }
 0x2eb   :  { %1181 = vsyncadd [#allocation4], 4294967168 }
 0x2ec   :  { %1060 = vsyncpa [#allocation3], 1 }
 0x2ed   :  { %1061 = vsyncpa [#allocation6], 1 }
 0x2ee   :  { %1062 = vsyncpa [#allocation4], 1 }

</bundles_post_ra>
